<compile_context>
chip_gen: v6e
topology: v6e:2x2x1
jax: 0.10.0
libtpu: 0.0.40
codegen_flags: <defaults>
</compile_context>

<pallas_src>
import jax
import jax.numpy as jnp
from jax.experimental import pallas as pl
from jax.experimental.pallas import tpu as pltpu

NEG_SLOPE = 0.01   # F.leaky_relu default
LANE = 128         # TPU lane width
TM_MAX = 2048      # max batch-tile rows per grid step (VMEM-safe on v7x too)


def _leaky_relu(x):
    return jnp.where(x >= 0, x, NEG_SLOPE * x)


def _round_up(n, m):
    return ((n + m - 1) // m) * m


def mlp_kernel(x_ref, w1_ref, b1_ref, w2_ref, b2_ref, w3r_ref, b3_ref, o_ref):
    # x tile: (TM, in_features); weights/biases are lane-padded & VMEM-resident.
    x = x_ref[...]

    # fc1 + leaky_relu  (MXU dot, f32 accumulation; elementwise in f32)
    h1 = jnp.dot(x, w1_ref[...], preferred_element_type=jnp.float32) + b1_ref[...]
    h1 = _leaky_relu(h1).astype(w2_ref.dtype)

    # fc2 + leaky_relu
    h2 = jnp.dot(h1, w2_ref[...], preferred_element_type=jnp.float32) + b2_ref[...]
    h2 = _leaky_relu(h2)                                  # stays f32

    # out (80 -> 1): VPU multiply + lane reduction instead of a 128-lane-padded
    # MXU dot; output tile is the real (TM, 1) column.
    y = jnp.sum(h2 * w3r_ref[...], axis=-1, keepdims=True) + b3_ref[...]
    o_ref[...] = y.astype(o_ref.dtype)


def prepare_params(params, compute_dtype=jnp.bfloat16):
    """One-time padding/casting of weights & biases (hoisted out of the forward).

    Returns (w1p, b1p, w2p, b2p, w3_row, b3_scalar) with hidden widths
    zero-padded to multiples of 128 and matmul weights cast to compute_dtype.
    """
    w1, b1, w2, b2, w3, b3 = params
    in_features, h1_w = w1.shape
    h2_w, out_w = w2.shape[1], w3.shape[1]
    assert out_w == 1, "final layer is specialized to output_features == 1"

    h1p = _round_up(h1_w, LANE)
    h2p = _round_up(h2_w, LANE)

    w1p = jnp.zeros((in_features, h1p), compute_dtype).at[:, :h1_w].set(
        w1.astype(compute_dtype))
    b1p = jnp.zeros((1, h1p), jnp.float32).at[:, :h1_w].set(
        b1.reshape(1, -1).astype(jnp.float32))
    w2p = jnp.zeros((h1p, h2p), compute_dtype).at[:h1_w, :h2_w].set(
        w2.astype(compute_dtype))
    b2p = jnp.zeros((1, h2p), jnp.float32).at[:, :h2_w].set(
        b2.reshape(1, -1).astype(jnp.float32))
    # Final layer kept in f32 as a single lane-padded row (VPU/XLU path).
    w3r = jnp.zeros((1, h2p), jnp.float32).at[:, :h2_w].set(
        w3.reshape(-1).astype(jnp.float32))
    b3s = b3.reshape(1, 1).astype(jnp.float32)
    return (w1p, b1p, w2p, b2p, w3r, b3s)


def salary_predictor_forward(x, prepared):
    """x: (B, input_features) float32; prepared: output of prepare_params()."""
    w1p, b1p, w2p, b2p, w3r, b3s = prepared
    B, in_features = x.shape
    compute_dtype = w1p.dtype
    h1p, h2p = w1p.shape[1], w2p.shape[1]

    # --- batch tiling: even split, tm multiple of 8, >=2 tiles for v7x megacore
    n_rows = _round_up(B, 8)
    n_tiles = max(pl.cdiv(n_rows, TM_MAX), 2 if n_rows > 8 else 1)
    tm = _round_up(pl.cdiv(n_rows, n_tiles), 8)
    n_tiles = pl.cdiv(n_rows, tm)
    b_pad = n_tiles * tm

    xc = x.astype(compute_dtype)
    if b_pad != B:
        xc = jnp.zeros((b_pad, in_features), compute_dtype).at[:B].set(xc)

    resident = lambda arr: pl.BlockSpec(arr.shape, lambda i: (0, 0))
    dsz = jnp.dtype(compute_dtype).itemsize

    flops = 2 * b_pad * (in_features * h1p + h1p * h2p + h2p)
    bytes_accessed = (b_pad * in_features * dsz                      # x read
                      + b_pad * 1 * 4                                # out write (real width)
                      + (w1p.size + w2p.size) * dsz                  # matmul weights
                      + (b1p.size + b2p.size + w3r.size + 1) * 4)    # biases + w3 row

    out = pl.pallas_call(
        mlp_kernel,
        out_shape=jax.ShapeDtypeStruct((b_pad, 1), jnp.float32),
        grid=(n_tiles,),
        in_specs=[
            pl.BlockSpec((tm, in_features), lambda i: (i, 0)),       # x: batch-tiled
            resident(w1p), resident(b1p),
            resident(w2p), resident(b2p),
            resident(w3r), resident(b3s),
        ],
        out_specs=pl.BlockSpec((tm, 1), lambda i: (i, 0)),           # narrow real output
        compiler_params=pltpu.CompilerParams(
            dimension_semantics=("parallel",)),                      # megacore on v7x
        cost_estimate=pl.CostEstimate(
            flops=flops, transcendentals=0, bytes_accessed=bytes_accessed),
    )(xc, w1p, b1p, w2p, b2p, w3r, b3s)

    return out[:B]


def init_params(key, input_features=10, hidden1=80, hidden2=80, output_features=1):
    """Deterministic init mimicking torch.nn.Linear's U(-1/sqrt(fan_in), 1/sqrt(fan_in))."""
    def linear(k, fan_in, fan_out):
        kw, kb = jax.random.split(k)
        bound = 1.0 / jnp.sqrt(fan_in)
        w = jax.random.uniform(kw, (fan_in, fan_out), jnp.float32, -bound, bound)
        b = jax.random.uniform(kb, (1, fan_out), jnp.float32, -bound, bound)
        return w, b

    k1, k2, k3 = jax.random.split(key, 3)
    w1, b1 = linear(k1, input_features, hidden1)
    w2, b2 = linear(k2, hidden1, hidden2)
    w3, b3 = linear(k3, hidden2, output_features)
    return (w1, b1, w2, b2, w3, b3)


def reference_forward(x, params):
    w1, b1, w2, b2, w3, b3 = params
    h1 = _leaky_relu(x @ w1 + b1)
    h2 = _leaky_relu(h1 @ w2 + b2)
    return h2 @ w3 + b3


if __name__ == "__main__":
    key = jax.random.PRNGKey(0)
    k_params, k_x = jax.random.split(key)

    batch = 8
    input_features = 10
    params = init_params(k_params, input_features=input_features)
    x = jax.random.normal(k_x, (batch, input_features), dtype=jnp.float32)

    ref = reference_forward(x, params)

    # f32 matmul path (tight tolerance; padding adds exact zeros)
    prepared_f32 = prepare_params(params, compute_dtype=jnp.float32)
    out_f32 = jax.block_until_ready(salary_predictor_forward(x, prepared_f32))
    assert out_f32.shape == (batch, 1)
    assert jnp.allclose(out_f32, ref, atol=1e-5, rtol=1e-5)

    # default bf16 matmul path (bf16-native MXU), f32 accumulation + f32 elementwise
    prepared_bf16 = prepare_params(params)
    out_bf16 = jax.block_until_ready(salary_predictor_forward(x, prepared_bf16))
    assert out_bf16.shape == (batch, 1)
    assert jnp.allclose(out_bf16, ref, atol=5e-2, rtol=5e-2)

    print("KERNEL_OK")
</pallas_src>

<mosaic_0001>
module attributes {stable_mosaic.version = 11 : i64} {
  func.func @mlp_kernel(%arg0: i32, %arg1: memref<8x10xf32, #tpu.memory_space<vmem>>, %arg2: memref<10x128xf32, #tpu.memory_space<vmem>>, %arg3: memref<1x128xf32, #tpu.memory_space<vmem>>, %arg4: memref<128x128xf32, #tpu.memory_space<vmem>>, %arg5: memref<1x128xf32, #tpu.memory_space<vmem>>, %arg6: memref<1x128xf32, #tpu.memory_space<vmem>>, %arg7: memref<1x1xf32, #tpu.memory_space<vmem>>, %arg8: memref<8x1xf32, #tpu.memory_space<vmem>>) attributes {dimension_semantics = [#tpu.dimension_semantics<parallel>], iteration_bounds = array<i64: 1>, scalar_prefetch = 0 : i64, scratch_operands = 0 : i64, tpu.core_type = #tpu.core_type<tc>, window_params = [{transform_indices = @transform_0, window_bounds = array<i64: 8, 10>}, {pipeline_mode = #tpu.pipeline_mode<synchronous>, transform_indices = @transform_1, window_bounds = array<i64: 10, 128>}, {pipeline_mode = #tpu.pipeline_mode<synchronous>, transform_indices = @transform_2, window_bounds = array<i64: 1, 128>}, {pipeline_mode = #tpu.pipeline_mode<synchronous>, transform_indices = @transform_3, window_bounds = array<i64: 128, 128>}, {pipeline_mode = #tpu.pipeline_mode<synchronous>, transform_indices = @transform_4, window_bounds = array<i64: 1, 128>}, {pipeline_mode = #tpu.pipeline_mode<synchronous>, transform_indices = @transform_5, window_bounds = array<i64: 1, 128>}, {pipeline_mode = #tpu.pipeline_mode<synchronous>, transform_indices = @transform_6, window_bounds = array<i64: 1, 1>}, {transform_indices = @transform_7, window_bounds = array<i64: 8, 1>}]} {
    %c0 = arith.constant 0 : index
    %c0_0 = arith.constant 0 : index
    %0 = vector.load %arg1[%c0, %c0_0] : memref<8x10xf32, #tpu.memory_space<vmem>>, vector<8x10xf32>
    %c0_1 = arith.constant 0 : index
    %c0_2 = arith.constant 0 : index
    %1 = vector.load %arg2[%c0_1, %c0_2] : memref<10x128xf32, #tpu.memory_space<vmem>>, vector<10x128xf32>
    %cst = arith.constant dense<0.000000e+00> : vector<8x128xf32>
    %2 = tpu.matmul %0, %1, %cst {dimension_numbers = #tpu.dot_dimension_numbers<[1], [0], [0], [1], [0, 0, 1, 1], [], []>} : vector<8x10xf32>, vector<10x128xf32>, vector<8x128xf32> -> vector<8x128xf32>
    %c0_3 = arith.constant 0 : index
    %c0_4 = arith.constant 0 : index
    %3 = vector.load %arg3[%c0_3, %c0_4] : memref<1x128xf32, #tpu.memory_space<vmem>>, vector<1x128xf32>
    %4 = vector.broadcast %3 : vector<1x128xf32> to vector<8x128xf32>
    %5 = arith.addf %2, %4 : vector<8x128xf32>
    %cst_5 = arith.constant 0.000000e+00 : f32
    %6 = vector.broadcast %cst_5 : f32 to vector<8x128xf32>
    %7 = arith.cmpf oge, %5, %6 : vector<8x128xf32>
    %cst_6 = arith.constant 0.00999999977 : f32
    %8 = vector.broadcast %cst_6 : f32 to vector<8x128xf32>
    %9 = arith.mulf %8, %5 : vector<8x128xf32>
    %10 = arith.select %7, %5, %9 : vector<8x128xi1>, vector<8x128xf32>
    %c0_7 = arith.constant 0 : index
    %c0_8 = arith.constant 0 : index
    %11 = vector.load %arg4[%c0_7, %c0_8] : memref<128x128xf32, #tpu.memory_space<vmem>>, vector<128x128xf32>
    %cst_9 = arith.constant dense<0.000000e+00> : vector<8x128xf32>
    %12 = tpu.matmul %10, %11, %cst_9 {dimension_numbers = #tpu.dot_dimension_numbers<[1], [0], [0], [1], [0, 0, 1, 1], [], []>} : vector<8x128xf32>, vector<128x128xf32>, vector<8x128xf32> -> vector<8x128xf32>
    %c0_10 = arith.constant 0 : index
    %c0_11 = arith.constant 0 : index
    %13 = vector.load %arg5[%c0_10, %c0_11] : memref<1x128xf32, #tpu.memory_space<vmem>>, vector<1x128xf32>
    %14 = vector.broadcast %13 : vector<1x128xf32> to vector<8x128xf32>
    %15 = arith.addf %12, %14 : vector<8x128xf32>
    %cst_12 = arith.constant 0.000000e+00 : f32
    %16 = vector.broadcast %cst_12 : f32 to vector<8x128xf32>
    %17 = arith.cmpf oge, %15, %16 : vector<8x128xf32>
    %cst_13 = arith.constant 0.00999999977 : f32
    %18 = vector.broadcast %cst_13 : f32 to vector<8x128xf32>
    %19 = arith.mulf %18, %15 : vector<8x128xf32>
    %20 = arith.select %17, %15, %19 : vector<8x128xi1>, vector<8x128xf32>
    %c0_14 = arith.constant 0 : index
    %c0_15 = arith.constant 0 : index
    %21 = vector.load %arg6[%c0_14, %c0_15] : memref<1x128xf32, #tpu.memory_space<vmem>>, vector<1x128xf32>
    %22 = vector.broadcast %21 : vector<1x128xf32> to vector<8x128xf32>
    %23 = arith.mulf %20, %22 : vector<8x128xf32>
    %cst_16 = arith.constant dense<0.000000e+00> : vector<8xf32>
    %24 = vector.multi_reduction <add>, %23, %cst_16 [1] : vector<8x128xf32> to vector<8xf32>
    %25 = vector.shape_cast %24 : vector<8xf32> to vector<8x1xf32>
    %c0_17 = arith.constant 0 : index
    %c0_18 = arith.constant 0 : index
    %26 = vector.load %arg7[%c0_17, %c0_18] : memref<1x1xf32, #tpu.memory_space<vmem>>, vector<1x1xf32>
    %27 = vector.broadcast %26 : vector<1x1xf32> to vector<8x1xf32>
    %28 = arith.addf %25, %27 : vector<8x1xf32>
    %c0_19 = arith.constant 0 : index
    %c0_20 = arith.constant 0 : index
    %29 = vector.load %arg8[%c0_19, %c0_20] : memref<8x1xf32, #tpu.memory_space<vmem>>, vector<8x1xf32>
    tpu.vector_store %arg8[%c0_19, %c0_20], %28 {strides = array<i32>} : memref<8x1xf32, #tpu.memory_space<vmem>>, vector<8x1xf32>,
    return
  }
  func.func @transform_0(%arg0: i32) -> (i32, i32) {
    %c0_i32 = arith.constant 0 : i32
    %c0_i32_0 = arith.constant 0 : i32
    return %arg0, %c0_i32 : i32, i32
  }
  func.func @transform_1(%arg0: i32) -> (i32, i32) {
    %c0_i32 = arith.constant 0 : i32
    %c0_i32_0 = arith.constant 0 : i32
    %c0_i32_1 = arith.constant 0 : i32
    return %c0_i32, %c0_i32_0 : i32, i32
  }
  func.func @transform_2(%arg0: i32) -> (i32, i32) {
    %c0_i32 = arith.constant 0 : i32
    %c0_i32_0 = arith.constant 0 : i32
    %c0_i32_1 = arith.constant 0 : i32
    return %c0_i32, %c0_i32_0 : i32, i32
  }
  func.func @transform_3(%arg0: i32) -> (i32, i32) {
    %c0_i32 = arith.constant 0 : i32
    %c0_i32_0 = arith.constant 0 : i32
    %c0_i32_1 = arith.constant 0 : i32
    return %c0_i32, %c0_i32_0 : i32, i32
  }
  func.func @transform_4(%arg0: i32) -> (i32, i32) {
    %c0_i32 = arith.constant 0 : i32
    %c0_i32_0 = arith.constant 0 : i32
    %c0_i32_1 = arith.constant 0 : i32
    return %c0_i32, %c0_i32_0 : i32, i32
  }
  func.func @transform_5(%arg0: i32) -> (i32, i32) {
    %c0_i32 = arith.constant 0 : i32
    %c0_i32_0 = arith.constant 0 : i32
    %c0_i32_1 = arith.constant 0 : i32
    return %c0_i32, %c0_i32_0 : i32, i32
  }
  func.func @transform_6(%arg0: i32) -> (i32, i32) {
    %c0_i32 = arith.constant 0 : i32
    %c0_i32_0 = arith.constant 0 : i32
    %c0_i32_1 = arith.constant 0 : i32
    return %c0_i32, %c0_i32_0 : i32, i32
  }
  func.func @transform_7(%arg0: i32) -> (i32, i32) {
    %c0_i32 = arith.constant 0 : i32
    %c0_i32_0 = arith.constant 0 : i32
    return %arg0, %c0_i32 : i32, i32
  }
}

</mosaic_0001>

<bundles_post_ra>
// kernel: tpu_custom_call.1
= control target key start
LH: loop header
LB: loop body
LE: loop exit
PB: predicated region body
PF: predicated region fallthrough
CT: control target
= control target key end

     0   :  { %s490_s0 = inlined_call_operand.hbm [shape: f32[8,10], index: 0, kind: input, shape index: {}]   ;;  %s491_s1 = inlined_call_operand.hbm [shape: f32[10,128], index: 1, kind: input, shape index: {}]   ;;  %s492_s2 = inlined_call_operand.vmem [shape: f32[1,128], index: 2, kind: input, shape index: {}]   ;;  %s493_s3 = inlined_call_operand.hbm [shape: f32[128,128], index: 3, kind: input, shape index: {}]   ;;  %s494_s4 = inlined_call_operand.vmem [shape: f32[1,128], index: 4, kind: input, shape index: {}]   ;;  %s495_s5 = inlined_call_operand.vmem [shape: f32[1,128], index: 5, kind: input, shape index: {}]   ;;  %s496_s6 = inlined_call_operand.<no memory space> [shape: f32[1,1], index: 6, kind: input, shape index: {}]   ;;  %s497_s7 = inlined_call_operand.vmem [shape: f32[8,1], index: 7, kind: output, shape index: {}]  }
   0x1   :  { %v12_v0 = vstv %s496_s6 }
   0x2   :  { %13 = vst [vmem:[#allocation2] sm:$0x1] %v12_v0 }
   0x3   :  { %14 = vsyncpa [#allocation4], 0 }
   0x4   :  { %15 = vsyncpa [#allocation6], 0  ;;  %s419_s26 = smov [#allocation5]  }
   0x5   :  { %s31_s27 = sshll.u32 %s419_s26, 4  ;;  %s32_s27 = int_to_ptr.vmem [resolvable:$true] %s31_s27 }
   0x6   :  { %s363_s28 = scalar_lea.vmem %s32_s27, 256  ;;  %p368_p1 = scmp.lt.s32.totalorder %s32_s27, %s32_s27 }
   0x7   :  { %p364_p0 = scmp.ne.s32.totalorder %s32_s27, %s363_s28  ;;  %p369_p2 = scmp.lt.s32.totalorder %s363_s28, %s363_s28 }
   0x9   :  { %p370_p3 = por %p369_p2, %p368_p1 }
   0xb   :  { %p371_p4 = pnand %p370_p3, %p364_p0 }
   0xd   :  { %374 = shalt.err (!%p371_p4)
}
   0xe   :  { %s420_s29 = smov 128   ;;  %s421_s30 = smov 8  }
   0xf   :  { %37 = dma.hbm_to_vmem [thread:$0]  %s491_s1, 256, %s32_s27, [#allocation6], %s420_s29, %s420_s29, %s421_s30  }
  0x10   :  { %s422_s6 = smov [#allocation3]   ;;  %s423_s11 = smov [#allocation7]  }
  0x11   :  { %s22_s10 = sshll.u32 %s422_s6, 4  ;;  %s45_s12 = sshll.u32 %s423_s11, 4  ;;  %s23_s10 = int_to_ptr.vmem [resolvable:$true] %s22_s10  ;;  %s46_s12 = int_to_ptr.vmem [resolvable:$true] %s45_s12 }
  0x12   :  { %s383_s13 = scalar_lea.vmem %s23_s10, 128  ;;  %p388_p6 = scmp.lt.s32.totalorder %s23_s10, %s23_s10 }
  0x13   :  { %p384_p5 = scmp.ne.s32.totalorder %s23_s10, %s383_s13  ;;  %p389_p7 = scmp.lt.s32.totalorder %s383_s13, %s383_s13 }
  0x15   :  { %p390_p8 = por %p389_p7, %p388_p6 }
  0x17   :  { %p391_p9 = pnand %p390_p8, %p384_p5 }
  0x19   :  { %394 = shalt.err (!%p391_p9)
}
  0x1a   :  { %25 = dma.hbm_to_vmem [thread:$0]  %s490_s0, 128, %s23_s10, [#allocation4]  }
  0x1b   :  { %s403_s16 = scalar_lea.vmem %s46_s12, 2048  ;;  %p408_p11 = scmp.lt.s32.totalorder %s46_s12, %s46_s12 }
  0x1c   :  { %p404_p10 = scmp.ne.s32.totalorder %s46_s12, %s403_s16  ;;  %p409_p12 = scmp.lt.s32.totalorder %s403_s16, %s403_s16 }
  0x1e   :  { %p410_p13 = por %p409_p12, %p408_p11 }
  0x20   :  { %p411_p0 = pnand %p410_p13, %p404_p10 }
  0x22   :  { %414 = shalt.err (!%p411_p0)
}
  0x23   :  { %51 = dma.hbm_to_vmem [thread:$0]  %s493_s3, 2048, %s46_s12, [#allocation6], %s420_s29, %s420_s29, %s421_s30  }
  0x24   :  { %415 = dma.done.wait [#allocation4], 128  }
  0x25   :  { %416 = vsyncadd [#allocation4], 4294967168 }
  0x26   :  { %417 = dma.done.wait [#allocation6], 2304  }
  0x27   :  { %418 = vsyncadd [#allocation6], 4294964992  ;;  %v424_v1 = vmov 0.0   ;;  %vm425_vm0 = vmmov 0   ;;  %vm81_vm1 = vcmask 1041408   ;;  %v68_v3 = vld [vmem:[#allocation5] sm:$0xff] }
  0x28   :  { %306 = vmatprep.subr.mxu0 %v424_v1  ;;  %310 = vmatprep.mubr.msk.f32.mxu0 %vm425_vm0, %v424_v1  ;;  %v69_v2 = vld [vmem:[#allocation5 + $0x8] sm:$0x3]  ;;  %v67_v4 = vld [vmem:[#allocation3] sm:$0xff]  ;;  %vm77_vm2 = vcmask 80896   ;;  %v172_v6 = vld [vmem:[#allocation7 + $0x70] sm:$0xff]  ;;  %vm272_vm5 = vcmask 7168  }
  0x29   :  { %313 = vmatprep.subr.mxu1 %v424_v1  ;;  %345 = vmatprep.mubr.msk.f32.mxu1 %vm425_vm0, %v424_v1  ;;  %v173_v5 = vld [vmem:[#allocation7 + $0x78] sm:$0xff]  ;;  %v171_v7 = vld [vmem:[#allocation7 + $0x68] sm:$0xff]  ;;  %v170_v8 = vld [vmem:[#allocation7 + $0x60] sm:$0xff] }
  0x2a   :  { %307 = vmatpush3.msk.msra.mxu0 %vm81_vm1, %v69_v2  ;;  %314 = vmatpush3.msra.mxu1 %v173_v5  ;;  %v169_v9 = vld [vmem:[#allocation7 + $0x58] sm:$0xff]  ;;  %v168_v10 = vld [vmem:[#allocation7 + $0x50] sm:$0xff]  ;;  %v167_v11 = vld [vmem:[#allocation7 + $0x48] sm:$0xff] }
  0x2b   :  { %308 = vmatprep.subr.mxu0 %v424_v1  ;;  %315 = vmatprep.subr.mxu1 %v424_v1  ;;  %v166_v12 = vld [vmem:[#allocation7 + $0x40] sm:$0xff]  ;;  %v165_v13 = vld [vmem:[#allocation7 + $0x38] sm:$0xff]  ;;  %v164_v14 = vld [vmem:[#allocation7 + $0x30] sm:$0xff] }
  0x2c   :  { %309 = vmatpush3.msra.mxu0 %v68_v3  ;;  %316 = vmatpush3.msra.mxu1 %v172_v6  ;;  %v163_v15 = vld [vmem:[#allocation7 + $0x28] sm:$0xff]  ;;  %v162_v16 = vld [vmem:[#allocation7 + $0x20] sm:$0xff]  ;;  %v161_v17 = vld [vmem:[#allocation7 + $0x18] sm:$0xff] }
  0x2d   :  { %311 = vmatmul.mubr.msk.f32.vlgmr.msra.gmra.mxu0 %vm77_vm2, %v67_v4  ;;  %317 = vmatprep.subr.mxu1 %v424_v1  ;;  %v160_v18 = vld [vmem:[#allocation7 + $0x10] sm:$0xff]  ;;  %v159_v19 = vld [vmem:[#allocation7 + $0x8] sm:$0xff]  ;;  %v158_v20 = vld [vmem:[#allocation7] sm:$0xff] }
  0x2e   :  { %318 = vmatpush3.msra.mxu1 %v171_v7  ;;  %v280_v21 = vld [vmem:[%s492_s2] ss:$0 sm:$0xff] }
  0x2f   :  { %319 = vmatprep.subr.mxu1 %v424_v1  ;;  %v283_v27 = vld [vmem:[%s494_s4] ss:$0 sm:$0xff] }
  0x30   :  { %320 = vmatpush3.msra.mxu1 %v170_v8  ;;  %v284_v32 = vld [vmem:[%s495_s5] ss:$0 sm:$0xff] }
  0x31   :  { %321 = vmatprep.subr.mxu1 %v424_v1  ;;  %v285_v35 = vld [vmem:[#allocation2] ss:$0 sm:$0xff] }
  0x32   :  { %322 = vmatpush3.msra.mxu1 %v169_v9 }
  0x33   :  { %323 = vmatprep.subr.mxu1 %v424_v1 }
  0x34   :  { %324 = vmatpush3.msra.mxu1 %v168_v10 }
  0x35   :  { %325 = vmatprep.subr.mxu1 %v424_v1 }
  0x36   :  { %326 = vmatpush3.msra.mxu1 %v167_v11 }
  0x37   :  { %327 = vmatprep.subr.mxu1 %v424_v1 }
  0x38   :  { %328 = vmatpush3.msra.mxu1 %v166_v12 }
  0x39   :  { %329 = vmatprep.subr.mxu1 %v424_v1 }
  0x3a   :  { %330 = vmatpush3.msra.mxu1 %v165_v13 }
  0x3b   :  { %331 = vmatprep.subr.mxu1 %v424_v1 }
  0x3c   :  { %332 = vmatpush3.msra.mxu1 %v164_v14 }
  0x3d   :  { %333 = vmatprep.subr.mxu1 %v424_v1 }
  0x3e   :  { %334 = vmatpush3.msra.mxu1 %v163_v15 }
  0x3f   :  { %335 = vmatprep.subr.mxu1 %v424_v1 }
  0x40   :  { %336 = vmatpush3.msra.mxu1 %v162_v16 }
  0x41   :  { %337 = vmatprep.subr.mxu1 %v424_v1 }
  0x42   :  { %338 = vmatpush3.msra.mxu1 %v161_v17 }
  0x43   :  { %339 = vmatprep.subr.mxu1 %v424_v1 }
  0x44   :  { %340 = vmatpush3.msra.mxu1 %v160_v18 }
  0x45   :  { %341 = vmatprep.subr.mxu1 %v424_v1 }
  0x46   :  { %342 = vmatpush3.msra.mxu1 %v159_v19 }
  0x47   :  { %343 = vmatprep.subr.mxu1 %v424_v1 }
  0x48   :  { %344 = vmatpush3.msra.mxu1 %v158_v20 }
  0xed   :  { %v151_v22 = vpop.f32.mrf.mxu0 }
  0xee   :  { %v152_v23 = vadd.f32 %v280_v21, %v151_v22 }
  0xef   :  { %v312_v24 = vpop.f32.mrf.mxu0 }
  0xf0   :  { %v156_v25 = vmul.f32 0.01, %v152_v23  ;;  %vm155_vm3 = vcmp.ge.f32.partialorder %v152_v23, 0.0 }
  0xf2   :  { %v157_v26 = vsel %vm155_vm3, %v152_v23, %v156_v25 }
  0xf3   :  { %346 = vmatmul.mubr.f32.vlgmr.msra.gmra.mxu1 %v157_v26 }
 0x1b3   :  { %v247_v28 = vpop.f32.mrf.mxu1 }
 0x1b4   :  { %v248_v29 = vadd.f32 %v283_v27, %v247_v28 }
 0x1b5   :  { %v347_v30 = vpop.f32.mrf.mxu1 }
 0x1b6   :  { %v252_v31 = vmul.f32 0.01, %v248_v29  ;;  %vm251_vm4 = vcmp.ge.f32.partialorder %v248_v29, 0.0 }
 0x1b8   :  { %v253_v33 = vsel %vm251_vm4, %v248_v29, %v252_v31 }
 0x1b9   :  { %v261_v34 = vmul.f32 %v284_v32, %v253_v33 }
 0x1bb   :  { %262 = vadd.xlane.f32.xlu0 %v261_v34 }
 0x244   :  { %v263_v36 = vpop.xlane.xlu0 %262 }
 0x245   :  { %v271_v37 = vadd.f32 %v285_v35, %v263_v36 }
 0x247   :  { %273 = vst.msk [vmem:[%s497_s7] sm:$0xff] %vm272_vm5, %v271_v37 }
 0x248   :  { %278 = vsyncpa [#allocation4], 1 }
 0x249   :  { %279 = vsyncpa [#allocation6], 1 }

</bundles_post_ra>
